<compile_context>
chip_gen: v7x
topology: tpu7x:2x2x1
jax: 0.10.0
libtpu: 0.0.40
codegen_flags: <defaults>
</compile_context>

<pallas_src>
import functools
import math

import jax
import jax.numpy as jnp
from jax import lax
from jax.experimental import pallas as pl
from jax.experimental.pallas import tpu as pltpu

EPS = 1e-5

_LANE = 128
_SUBLANE = 8
# Safe on v7x (64 MiB physical VMEM per TC) and a large raise over the scoped
# defaults (16 MiB on v5e / 32 MiB on v6e+).
_VMEM_LIMIT_BYTES = 48 * 1024 * 1024
# Budget for (x-in + out) * 2 double-buffers worth of tiles.
_TILE_BYTES_BUDGET = 36 * 1024 * 1024
_MAX_TILE_ROWS = 1024


def _round_up(n, m):
    return ((n + m - 1) // m) * m


def _choose_tile_rows(rows, hidden_pad, dtype_bytes):
    """Largest row tile whose double-buffered in+out slabs fit the VMEM budget."""
    per_row_slab = 4 * hidden_pad * dtype_bytes  # (in + out) * 2 buffers
    tile = (_TILE_BYTES_BUDGET // per_row_slab) // _SUBLANE * _SUBLANE
    tile = max(_SUBLANE, min(_MAX_TILE_ROWS, tile))
    # Rebalance so row padding stays small (avoid e.g. rows=tile+1 -> 2x work).
    n_steps = max(1, math.ceil(rows / tile))
    tile = _round_up(math.ceil(rows / n_steps), _SUBLANE)
    return tile


def _ln_math(x_f32, w_f32, b_f32, hidden, needs_mask):
    """Shared LayerNorm math on an f32 (tile_rows, hidden_pad) block."""
    if needs_mask:
        col = lax.broadcasted_iota(jnp.int32, x_f32.shape, 1)
        valid = col < hidden
        x_f32 = jnp.where(valid, x_f32, 0.0)
    inv_h = jnp.float32(1.0 / hidden)
    mean = jnp.sum(x_f32, axis=-1, keepdims=True) * inv_h
    xc = x_f32 - mean
    if needs_mask:
        xc = jnp.where(valid, xc, 0.0)
    var = jnp.sum(xc * xc, axis=-1, keepdims=True) * inv_h
    y = xc * lax.rsqrt(var + EPS)          # rsqrt -> EUP (free slot)
    y = y * w_f32
    if b_f32 is not None:
        y = y + b_f32
    return y


def _ln_kernel_bias(x_ref, w_ref, b_ref, o_ref, *, hidden, needs_mask):
    y = _ln_math(
        x_ref[...].astype(jnp.float32),
        w_ref[...].astype(jnp.float32),
        b_ref[...].astype(jnp.float32),
        hidden,
        needs_mask,
    )
    o_ref[...] = y.astype(o_ref.dtype)


def _ln_kernel_nobias(x_ref, w_ref, o_ref, *, hidden, needs_mask):
    y = _ln_math(
        x_ref[...].astype(jnp.float32),
        w_ref[...].astype(jnp.float32),
        None,
        hidden,
        needs_mask,
    )
    o_ref[...] = y.astype(o_ref.dtype)


@jax.jit
def _layer_norm_2d(x2, weight, bias):
    rows, hidden = x2.shape
    hidden_pad = _round_up(hidden, _LANE)
    needs_mask = hidden_pad != hidden
    dtype_bytes = jnp.dtype(x2.dtype).itemsize

    tile_rows = _choose_tile_rows(rows, hidden_pad, dtype_bytes)
    rows_pad = _round_up(rows, tile_rows)

    xp = x2
    if rows_pad != rows or needs_mask:
        xp = jnp.pad(x2, ((0, rows_pad - rows), (0, hidden_pad - hidden)))
    w2 = jnp.pad(weight, (0, hidden_pad - hidden)).reshape(1, hidden_pad)

    grid = (rows_pad // tile_rows,)
    x_spec = pl.BlockSpec((tile_rows, hidden_pad), lambda i: (i, 0))
    wb_spec = pl.BlockSpec((1, hidden_pad), lambda i: (0, 0))
    out_spec = pl.BlockSpec((tile_rows, hidden_pad), lambda i: (i, 0))

    has_bias = bias is not None
    if has_bias:
        kernel = functools.partial(
            _ln_kernel_bias, hidden=hidden, needs_mask=needs_mask
        )
        in_specs = [x_spec, wb_spec, wb_spec]
        b2 = jnp.pad(bias, (0, hidden_pad - hidden)).reshape(1, hidden_pad)
        operands = (xp, w2, b2)
    else:
        kernel = functools.partial(
            _ln_kernel_nobias, hidden=hidden, needs_mask=needs_mask
        )
        in_specs = [x_spec, wb_spec]
        operands = (xp, w2)

    out = pl.pallas_call(
        kernel,
        out_shape=jax.ShapeDtypeStruct((rows_pad, hidden_pad), x2.dtype),
        grid_spec=pltpu.PrefetchScalarGridSpec(
            num_scalar_prefetch=0,
            grid=grid,
            in_specs=in_specs,
            out_specs=out_spec,
        ),
        compiler_params=pltpu.CompilerParams(
            dimension_semantics=("parallel",),
            vmem_limit_bytes=_VMEM_LIMIT_BYTES,
        ),
    )(*operands)

    if rows_pad != rows or needs_mask:
        out = out[:rows, :hidden]
    return out


def layer_norm_pallas(x, weight, bias=None):
    """x: (..., hidden). weight/(optional) bias: (hidden,).
    Matches F.layer_norm(x, (hidden,), weight, bias, 1e-5)."""
    orig_shape = x.shape
    hidden = orig_shape[-1]
    x2 = x.reshape(-1, hidden)
    out = _layer_norm_2d(x2, weight, bias)
    return out.reshape(orig_shape)


class LayerNormPallas:
    """Mirror of the PyTorch module: weight=ones(ndim); bias=zeros(ndim) if bias else None."""

    def __init__(self, ndim, bias=True):
        self.weight = jnp.ones((ndim,), dtype=jnp.float32)
        self.bias = jnp.zeros((ndim,), dtype=jnp.float32) if bias else None

    def __call__(self, x):
        # bias=None takes the specialized no-bias kernel path (no zero vector DMA).
        return layer_norm_pallas(x, self.weight, self.bias)


def _reference_layer_norm(x, weight, bias, eps=EPS):
    mean = jnp.mean(x, axis=-1, keepdims=True)
    var = jnp.mean((x - mean) ** 2, axis=-1, keepdims=True)
    y = (x - mean) / jnp.sqrt(var + eps)
    y = y * weight
    if bias is not None:
        y = y + bias
    return y


if __name__ == "__main__":
    key = jax.random.PRNGKey(0)
    batch, seq, hidden = 2, 8, 32
    x = jax.random.normal(key, (batch, seq, hidden), dtype=jnp.float32)

    # bias=True case
    ln = LayerNormPallas(hidden, bias=True)
    out = ln(x)
    jax.block_until_ready(out)
    ref = _reference_layer_norm(x, ln.weight, ln.bias)
    assert out.shape == x.shape and out.dtype == x.dtype
    assert jnp.max(jnp.abs(out - ref)) < 1e-5

    # bias=False case (specialized kernel path)
    ln_nb = LayerNormPallas(hidden, bias=False)
    out_nb = ln_nb(x)
    jax.block_until_ready(out_nb)
    ref_nb = _reference_layer_norm(x, ln_nb.weight, None)
    assert jnp.max(jnp.abs(out_nb - ref_nb)) < 1e-5

    print("KERNEL_OK")
</pallas_src>

<mosaic_0001>
module attributes {stable_mosaic.version = 11 : i64} {
  func.func @_ln_kernel_bias(%arg0: i32, %arg1: memref<16x128xf32, #tpu.memory_space<vmem>>, %arg2: memref<1x128xf32, #tpu.memory_space<vmem>>, %arg3: memref<1x128xf32, #tpu.memory_space<vmem>>, %arg4: memref<16x128xf32, #tpu.memory_space<vmem>>) attributes {dimension_semantics = [#tpu.dimension_semantics<parallel>], iteration_bounds = array<i64: 1>, scalar_prefetch = 0 : i64, scratch_operands = 0 : i64, tpu.core_type = #tpu.core_type<tc>, window_params = [{transform_indices = @transform_0, window_bounds = array<i64: 16, 128>}, {pipeline_mode = #tpu.pipeline_mode<synchronous>, transform_indices = @transform_1, window_bounds = array<i64: 1, 128>}, {pipeline_mode = #tpu.pipeline_mode<synchronous>, transform_indices = @transform_2, window_bounds = array<i64: 1, 128>}, {transform_indices = @transform_3, window_bounds = array<i64: 16, 128>}]} {
    %c0 = arith.constant 0 : index
    %c0_0 = arith.constant 0 : index
    %0 = vector.load %arg1[%c0, %c0_0] : memref<16x128xf32, #tpu.memory_space<vmem>>, vector<16x128xf32>
    %c0_1 = arith.constant 0 : index
    %c0_2 = arith.constant 0 : index
    %1 = vector.load %arg2[%c0_1, %c0_2] : memref<1x128xf32, #tpu.memory_space<vmem>>, vector<1x128xf32>
    %c0_3 = arith.constant 0 : index
    %c0_4 = arith.constant 0 : index
    %2 = vector.load %arg3[%c0_3, %c0_4] : memref<1x128xf32, #tpu.memory_space<vmem>>, vector<1x128xf32>
    %3 = tpu.iota {dimensions = array<i32: 1>} : vector<16x128xi32>
    %c32_i32 = arith.constant 32 : i32
    %4 = vector.broadcast %c32_i32 : i32 to vector<16x128xi32>
    %5 = arith.cmpi slt, %3, %4 : vector<16x128xi32>
    %cst = arith.constant 0.000000e+00 : f32
    %6 = vector.broadcast %cst : f32 to vector<16x128xf32>
    %7 = arith.select %5, %0, %6 : vector<16x128xi1>, vector<16x128xf32>
    %cst_5 = arith.constant dense<0.000000e+00> : vector<16xf32>
    %8 = vector.multi_reduction <add>, %7, %cst_5 [1] : vector<16x128xf32> to vector<16xf32>
    %9 = vector.shape_cast %8 : vector<16xf32> to vector<16x1xf32>
    %cst_6 = arith.constant 3.125000e-02 : f32
    %10 = vector.broadcast %cst_6 : f32 to vector<16x1xf32>
    %11 = arith.mulf %9, %10 : vector<16x1xf32>
    %12 = vector.broadcast %11 : vector<16x1xf32> to vector<16x128xf32>
    %13 = arith.subf %7, %12 : vector<16x128xf32>
    %cst_7 = arith.constant 0.000000e+00 : f32
    %14 = vector.broadcast %cst_7 : f32 to vector<16x128xf32>
    %15 = arith.select %5, %13, %14 : vector<16x128xi1>, vector<16x128xf32>
    %16 = arith.mulf %15, %15 : vector<16x128xf32>
    %cst_8 = arith.constant dense<0.000000e+00> : vector<16xf32>
    %17 = vector.multi_reduction <add>, %16, %cst_8 [1] : vector<16x128xf32> to vector<16xf32>
    %18 = vector.shape_cast %17 : vector<16xf32> to vector<16x1xf32>
    %cst_9 = arith.constant 3.125000e-02 : f32
    %19 = vector.broadcast %cst_9 : f32 to vector<16x1xf32>
    %20 = arith.mulf %18, %19 : vector<16x1xf32>
    %cst_10 = arith.constant 9.99999974E-6 : f32
    %21 = vector.broadcast %cst_10 : f32 to vector<16x1xf32>
    %22 = arith.addf %20, %21 : vector<16x1xf32>
    %23 = math.rsqrt %22 : vector<16x1xf32>
    %24 = vector.broadcast %23 : vector<16x1xf32> to vector<16x128xf32>
    %25 = arith.mulf %15, %24 : vector<16x128xf32>
    %26 = vector.broadcast %1 : vector<1x128xf32> to vector<16x128xf32>
    %27 = arith.mulf %25, %26 : vector<16x128xf32>
    %28 = vector.broadcast %2 : vector<1x128xf32> to vector<16x128xf32>
    %29 = arith.addf %27, %28 : vector<16x128xf32>
    %c0_11 = arith.constant 0 : index
    %c0_12 = arith.constant 0 : index
    %30 = vector.load %arg4[%c0_11, %c0_12] : memref<16x128xf32, #tpu.memory_space<vmem>>, vector<16x128xf32>
    tpu.vector_store %arg4[%c0_11, %c0_12], %29 {strides = array<i32>} : memref<16x128xf32, #tpu.memory_space<vmem>>, vector<16x128xf32>,
    return
  }
  func.func @transform_0(%arg0: i32) -> (i32, i32) {
    %c0_i32 = arith.constant 0 : i32
    %c0_i32_0 = arith.constant 0 : i32
    return %arg0, %c0_i32 : i32, i32
  }
  func.func @transform_1(%arg0: i32) -> (i32, i32) {
    %c0_i32 = arith.constant 0 : i32
    %c0_i32_0 = arith.constant 0 : i32
    %c0_i32_1 = arith.constant 0 : i32
    return %c0_i32, %c0_i32_0 : i32, i32
  }
  func.func @transform_2(%arg0: i32) -> (i32, i32) {
    %c0_i32 = arith.constant 0 : i32
    %c0_i32_0 = arith.constant 0 : i32
    %c0_i32_1 = arith.constant 0 : i32
    return %c0_i32, %c0_i32_0 : i32, i32
  }
  func.func @transform_3(%arg0: i32) -> (i32, i32) {
    %c0_i32 = arith.constant 0 : i32
    %c0_i32_0 = arith.constant 0 : i32
    return %arg0, %c0_i32 : i32, i32
  }
}

</mosaic_0001>

<bundles_post_ra>
// kernel: _layer_norm_2d.1
= control target key start
LH: loop header
LB: loop body
LE: loop exit
PB: predicated region body
PF: predicated region fallthrough
CT: control target
= control target key end

     0   :  { %v19_v0 = vlaneseq  ;;  %s162_s0 = inlined_call_operand.vmem [shape: f32[16,128], index: 0, kind: input, shape index: {}]   ;;  %s163_s1 = inlined_call_operand.vmem [shape: f32[1,128], index: 1, kind: input, shape index: {}]   ;;  %s164_s2 = inlined_call_operand.vmem [shape: f32[1,128], index: 2, kind: input, shape index: {}]   ;;  %s165_s3 = inlined_call_operand.hbm [shape: f32[16,128], index: 3, kind: output, shape index: {}]  }
   0x1   :  { %8 = vsyncpa [#allocation3], 0  ;;  %v15_v1 = vld [vmem:[%s162_s0] sm:$0xff]  ;;  %v16_v3 = vld [vmem:[%s162_s0 + $0x8] sm:$0xff]  ;;  %s115_s19 = smov [#allocation2]  }
   0x2   :  { %v20_v2 = vand.u32 127, %v19_v0  ;;  %v82_v23 = vld [vmem:[%s163_s1] ss:$0 sm:$0xff]  ;;  %s71_s20 = sshll.u32 %s115_s19, 4  ;;  %s72_s20 = int_to_ptr.vmem [resolvable:$true] %s71_s20 }
   0x3   :  { %v83_v25 = vld [vmem:[%s164_s2] ss:$0 sm:$0xff]  ;;  %s91_s21 = scalar_lea.vmem %s72_s20, 256  ;;  %p96_p1 = scmp.lt.s32.totalorder %s72_s20, %s72_s20 }
   0x4   :  { %vm21_vm0 = vcmp.lt.s32.totalorder %v20_v2, 32  ;;  %p92_p0 = scmp.ne.s32.totalorder %s72_s20, %s91_s21  ;;  %p97_p2 = scmp.lt.s32.totalorder %s91_s21, %s91_s21 }
   0x5   :  { %v22_v4 = vsel %vm21_vm0, %v15_v1, 0.0  ;;  %v23_v5 = vsel %vm21_vm0, %v16_v3, 0.0 }
   0x6   :  { %24 = vadd.xlane.f32.xlu0 %v22_v4  ;;  %p98_p3 = por %p97_p2, %p96_p1 }
   0x8   :  { %p99_p4 = pnand %p98_p3, %p92_p0 }
   0xa   :  { %26 = vadd.xlane.f32.xlu0 %v23_v5 }
  0x93   :  { %v25_v6 = vpop.xlane.xlu0 %24 }
  0x94   :  { %v28_v7 = vmul.f32 0.03125, %v25_v6 }
  0x96   :  { %v30_v8 = vsub.f32 %v22_v4, %v28_v7 }
  0x97   :  { %v27_v9 = vpop.xlane.xlu0 %26 }
  0x98   :  { %v29_v10 = vmul.f32 0.03125, %v27_v9  ;;  %v32_v11 = vsel %vm21_vm0, %v30_v8, 0.0 }
  0x99   :  { %v34_v12 = vmul.f32 %v32_v11, %v32_v11 }
  0x9a   :  { %v31_v13 = vsub.f32 %v23_v5, %v29_v10 }
  0x9b   :  { %36 = vadd.xlane.f32.xlu1 %v34_v12 }
  0x9c   :  { %v33_v14 = vsel %vm21_vm0, %v31_v13, 0.0 }
  0x9d   :  { %v35_v15 = vmul.f32 %v33_v14, %v33_v14 }
  0x9f   :  { %38 = vadd.xlane.f32.xlu1 %v35_v15 }
 0x128   :  { %v37_v16 = vpop.xlane.xlu1 %36 }
 0x129   :  { %v40_v17 = vmul.f32 0.03125, %v37_v16 }
 0x12b   :  { %v42_v18 = vadd.f32 1e-05, %v40_v17 }
 0x12c   :  { %v39_v19 = vpop.xlane.xlu1 %38 }
 0x12d   :  { %87 = vrsqrt.f32 %v42_v18  ;;  %v41_v20 = vmul.f32 0.03125, %v39_v19 }
 0x12f   :  { %v43_v21 = vadd.f32 1e-05, %v41_v20 }
 0x131   :  { %89 = vrsqrt.f32 %v43_v21 }
 0x137   :  { %v88_v22 = vpop.eup %87 }
 0x138   :  { %v46_v24 = vmul.f32 %v88_v22, %v32_v11 }
 0x13a   :  { %v54_v26 = vmul.f32 %v82_v23, %v46_v24 }
 0x13b   :  { %v90_v27 = vpop.eup %89 }
 0x13c   :  { %v47_v28 = vmul.f32 %v90_v27, %v33_v14  ;;  %v62_v29 = vadd.f32 %v83_v25, %v54_v26 }
 0x13e   :  { %v55_v30 = vmul.f32 %v82_v23, %v47_v28  ;;  %64 = vst [vmem:[#allocation2] sm:$0xff] %v62_v29 }
 0x140   :  { %v63_v31 = vadd.f32 %v83_v25, %v55_v30 }
 0x142   :  { %65 = vst [vmem:[#allocation2 + $0x8] sm:$0xff] %v63_v31 }
 0x143   :  { %102 = shalt.err (!%p99_p4)
}
 0x144   :  { %s103_s22 = scalar_lea.hbm %s165_s3, 256 }
 0x145   :  { %p104_p5 = scmp.ne.s32.totalorder %s165_s3, %s103_s22  ;;  %p107_p6 = scmp.lt.u32.totalorder %s103_s22, %s165_s3 }
 0x147   :  { %p109_p7 = pnand %p107_p6, %p104_p5 }
 0x149   :  { %112 = shalt.err (!%p109_p7)
}
 0x14a   :  { %s116_s27 = smov 128   ;;  %s117_s28 = smov 8  }
 0x14b   :  { %77 = dma.vmem_to_hbm [thread:$0]  %s72_s20, 256, %s165_s3, [#allocation3], %s116_s27, %s116_s27, %s117_s28  }
 0x14c   :  { %113 = dma.done.wait [#allocation3], 256  }
 0x14d   :  { %114 = vsyncadd [#allocation3], 4294967040 }
 0x14e   :  { %81 = vsyncpa [#allocation3], 1 }

</bundles_post_ra>
